<compile_context>
chip_gen: v7x
topology: tpu7x:2x2x1
jax: 0.10.0
libtpu: 0.0.40
codegen_flags: <defaults>
</compile_context>

<pallas_src>
import functools

import jax
import jax.numpy as jnp
from jax.experimental import pallas as pl
from jax.experimental.pallas import tpu as pltpu


def _vmem_limit_bytes():
    """Per-generation scoped-VMEM budget: ~half of physical VMEM capped at
    96 MiB (=> ~64 MiB on v5e/v6e's 128 MiB, 32 MiB on v7x's 64 MiB)."""
    try:
        cap = getattr(pltpu.get_tpu_info(), "vmem_capacity_bytes", None)
    except Exception:
        cap = None
    if not cap:
        return 32 * 1024 * 1024
    return int(min(cap // 2, 96 * 1024 * 1024))


def _single_buffered(block_shape, index_map):
    """Constant-index (resident) block: request single buffering when the
    running jax supports pipeline_mode; otherwise default double buffering."""
    try:
        return pl.BlockSpec(block_shape, index_map, pipeline_mode=pl.Buffered(1))
    except Exception:
        return pl.BlockSpec(block_shape, index_map)


def _pick_q_tile(len_q, len_k, n_head, attn_itemsize, vmem_limit, return_attn):
    q_tile = min(len_q, 256)                 # >=256 sublanes feed the MXU well
    if return_attn and attn_itemsize:
        # keep the double-buffered attention-probability block inside ~half
        # of the scoped-VMEM budget.
        budget = max(vmem_limit // 2, 4 * 1024 * 1024)
        per_row = max(1, 2 * n_head * len_k * attn_itemsize)
        q_tile = min(q_tile, max(8, budget // per_row))
    if q_tile >= len_q:
        return len_q                         # full extent (always legal)
    return max(8, q_tile - (q_tile % 8))     # sublane multiple


def _pick_row_tile(rows, d_model, vmem_limit):
    # ~6 row-tiles of d_model f32 live (x, r, out double-buffered); keep them
    # under roughly half of the scoped budget, 1024 rows max.
    budget = max(vmem_limit // 2, 8 * 1024 * 1024)
    tr = budget // (6 * max(d_model, 1) * 4)
    tr = int(max(8, min(1024, tr)))
    tr -= tr % 8
    if rows <= tr:
        return rows
    return max(8, tr)


# ---------------------------------------------------------------------------
# Kernel 1: scaled-dot-product attention, all n_head heads of one
# (batch, q-tile) block per grid step, lane-dense (q_tile, d_model) output.
# ---------------------------------------------------------------------------
def attention_all_heads(qc, kc, vc, m8, *, n_head, d_k, compute_dtype,
                        return_attn, attn_dtype, vmem_limit):
    sz_b, len_q, d_model = qc.shape
    len_k = kc.shape[1]
    attn_itemsize = jnp.dtype(attn_dtype).itemsize if return_attn else 0
    q_tile = _pick_q_tile(len_q, len_k, n_head, attn_itemsize,
                          vmem_limit, return_attn)
    n_qt = pl.cdiv(len_q, q_tile)
    inv_norm = 1.0 / float(d_k) ** 0.5
    approx_recip = (compute_dtype != jnp.float32)

    def kernel(q_ref, k_ref, v_ref, mask_ref, o_ref, *rest):
        attn_ref = rest[0] if return_attn else None
        b = pl.program_id(0)
        # Fold 1/sqrt(d_k) into the q tile once (q_tile*d_model multiplies)
        # instead of scaling every (q_tile, len_k) score matrix per head.
        qs = q_ref[0] * jnp.asarray(inv_norm, dtype=compute_dtype)
        kk = k_ref[0]                           # (len_k, d_model)
        vv = v_ref[0]                           # (len_k, d_model)

        for h in range(n_head):                 # static unroll over heads
            lo = h * d_k
            qh = qs[:, lo:lo + d_k]             # (q_tile, d_k)
            kh = kk[:, lo:lo + d_k]
            vh = vv[:, lo:lo + d_k]

            # The module masks slice j = b*n_head + h with mask[j % sz_b]
            # (mask.repeat(n_head,1,1) + b-major head split).
            m = mask_ref[(b * n_head + h) % sz_b]         # (q_tile, len_k) i8

            # QK^T: contract the last dims directly (no in-kernel transpose).
            s = jax.lax.dot_general(qh, kh, (((1,), (1,)), ((), ())),
                                    preferred_element_type=jnp.float32)
            s = jnp.where(m != 0, jnp.float32(-1e9), s)

            # softmax over the last axis (torch Softmax(dim=2)); stats in f32.
            s = s - jnp.max(s, axis=-1, keepdims=True)
            e = jnp.exp(s)
            denom = jnp.sum(e, axis=-1, keepdims=True)
            p = e * pl.reciprocal(denom, approx=approx_recip)

            if return_attn:
                attn_ref[0, h] = p.astype(attn_dtype)

            # Write this head straight into its lane slot of the output tile:
            # one head's intermediates live at a time, no concatenate/relayout.
            o_ref[0, :, lo:lo + d_k] = jnp.dot(
                p.astype(compute_dtype), vh,
                preferred_element_type=jnp.float32).astype(compute_dtype)

    in_specs = [
        pl.BlockSpec((1, q_tile, d_model), lambda b, qi: (b, qi, 0)),
        pl.BlockSpec((1, len_k, d_model), lambda b, qi: (b, 0, 0)),
        pl.BlockSpec((1, len_k, d_model), lambda b, qi: (b, 0, 0)),
        # int8 mask: all batches along axis 0 (dynamic row pick per head),
        # but tiled along q so VMEM stays bounded for long sequences.
        pl.BlockSpec((sz_b, q_tile, len_k), lambda b, qi: (0, qi, 0)),
    ]
    out_shape = [jax.ShapeDtypeStruct((sz_b, len_q, d_model), compute_dtype)]
    out_specs = [pl.BlockSpec((1, q_tile, d_model), lambda b, qi: (b, qi, 0))]
    if return_attn:
        out_shape.append(
            jax.ShapeDtypeStruct((sz_b, n_head, len_q, len_k), attn_dtype))
        out_specs.append(
            pl.BlockSpec((1, n_head, q_tile, len_k),
                         lambda b, qi: (b, 0, qi, 0)))

    res = pl.pallas_call(
        kernel,
        out_shape=tuple(out_shape),
        grid_spec=pltpu.PrefetchScalarGridSpec(
            num_scalar_prefetch=0,
            grid=(sz_b, n_qt),
            in_specs=in_specs,
            out_specs=out_specs),
        compiler_params=pltpu.CompilerParams(
            dimension_semantics=("parallel", "parallel"),
            vmem_limit_bytes=vmem_limit),
    )(qc, kc, vc, m8)

    if return_attn:
        return res[0], res[1]
    return (res[0] if isinstance(res, (tuple, list)) else res), None


# ---------------------------------------------------------------------------
# Kernel 2: fc (Linear, weight pre-transposed to (in,out)) + residual +
# LayerNorm, row-tiled over flattened tokens, megacore-parallel.
# ---------------------------------------------------------------------------
def _fc_ln_kernel(x_ref, r_ref, wt_ref, fb_ref, g_ref, bb_ref, o_ref, *, eps):
    # x/wt may be bf16 (boundary cast); accumulation and statistics are f32.
    y = jnp.dot(x_ref[...], wt_ref[...], preferred_element_type=jnp.float32)
    y = y + fb_ref[...] + r_ref[...]
    mean = jnp.mean(y, axis=-1, keepdims=True)
    var = jnp.mean(jnp.square(y - mean), axis=-1, keepdims=True)
    o_ref[...] = (y - mean) * jax.lax.rsqrt(var + eps) * g_ref[...] + bb_ref[...]


def fc_residual_layernorm(x, r, wt, fb, g, bb, *, eps=1e-5, vmem_limit):
    rows, d_model = x.shape
    tr = _pick_row_tile(rows, d_model, vmem_limit)
    kern = functools.partial(_fc_ln_kernel, eps=eps)
    return pl.pallas_call(
        kern,
        out_shape=jax.ShapeDtypeStruct((rows, d_model), jnp.float32),
        grid_spec=pltpu.PrefetchScalarGridSpec(
            num_scalar_prefetch=0,
            grid=(pl.cdiv(rows, tr),),
            in_specs=[
                pl.BlockSpec((tr, d_model), lambda i: (i, 0)),
                pl.BlockSpec((tr, d_model), lambda i: (i, 0)),
                # resident parameters: constant index maps, single-buffered.
                _single_buffered((d_model, d_model), lambda i: (0, 0)),
                _single_buffered((1, d_model), lambda i: (0, 0)),
                _single_buffered((1, d_model), lambda i: (0, 0)),
                _single_buffered((1, d_model), lambda i: (0, 0)),
            ],
            out_specs=pl.BlockSpec((tr, d_model), lambda i: (i, 0)),
        ),
        compiler_params=pltpu.CompilerParams(
            dimension_semantics=("parallel",),
            vmem_limit_bytes=vmem_limit),
    )(x, r, wt, fb, g, bb)


# ---------------------------------------------------------------------------
# MultiHeadAttention forward (glue in plain JAX, matching PyTorch exactly).
# ---------------------------------------------------------------------------
def multi_head_attention(params, q, k, v, mask, *, compute_dtype=jnp.float32,
                         return_attn=True, attn_dtype=jnp.float32):
    n_head, d_k = params["n_head"], params["d_k"]
    len_q, sz_b, d_model = q.shape
    len_k = k.shape[0]
    vmem_limit = _vmem_limit_bytes()

    # time-major -> batch-major (qb is reused as the f32 residual below).
    qb = jnp.transpose(q, (1, 0, 2))                  # (sz_b, len_q, d_model)
    kb = jnp.transpose(k, (1, 0, 2))
    vb = jnp.transpose(v, (1, 0, 2))
    # boundary casts: halve HBM operand traffic on the bf16 path (no-op f32).
    qc, kc, vc = (t.astype(compute_dtype) for t in (qb, kb, vb))
    m8 = mask.astype(jnp.int8)                        # 1 byte/elem, no n_head copy

    a, attn = attention_all_heads(qc, kc, vc, m8, n_head=n_head, d_k=d_k,
                                  compute_dtype=compute_dtype,
                                  return_attn=return_attn,
                                  attn_dtype=attn_dtype,
                                  vmem_limit=vmem_limit)

    # The module's exact head recombination:
    #   output.view(n_head, sz_b, len_q, d_k).permute(1,2,0,3).view(sz_b, len_q, -1)
    # Kernel 1 stored heads h-major within each source batch (flat j =
    # b*n_head + h, same as torch's .view(sz_b*n_head, len_q, d_k)), so replay
    # the same reshapes/permutes (one XLA copy, half-width on the bf16 path).
    o_flat = jnp.transpose(a.reshape(sz_b, len_q, n_head, d_k), (0, 2, 1, 3))
    o_flat = o_flat.reshape(sz_b * n_head, len_q, d_k)
    f = jnp.transpose(o_flat.reshape(n_head, sz_b, len_q, d_k), (1, 2, 0, 3))
    f = f.reshape(sz_b, len_q, d_model)

    # fc + residual + LayerNorm (row-tiled); fc weight pre-transposed to
    # (in, out) and cast to the MXU dtype; residual stays f32.
    wt = jnp.transpose(params["fc_w"]).astype(compute_dtype)
    fb = params["fc_b"].reshape(1, d_model)
    g = params["ln_g"].reshape(1, d_model)
    bb = params["ln_b"].reshape(1, d_model)
    y_rows = fc_residual_layernorm(
        f.reshape(sz_b * len_q, d_model), qb.reshape(sz_b * len_q, d_model),
        wt, fb, g, bb, vmem_limit=vmem_limit)

    y = jnp.transpose(y_rows.reshape(sz_b, len_q, d_model), (1, 0, 2))
    if return_attn:
        attn = attn.reshape(sz_b * n_head, len_q, len_k)  # flat j = b*n_head+h
    return y, attn


# ---------------------------------------------------------------------------
# Pure-JAX reference (replays the PyTorch forward op-for-op).
# ---------------------------------------------------------------------------
def reference(params, q, k, v, mask):
    n_head, d_k = params["n_head"], params["d_k"]
    len_q, sz_b, d_model = q.shape
    len_k = k.shape[0]
    residual = q
    mask_rep = jnp.tile(mask, (n_head, 1, 1))

    def split_heads(x, L):
        x = jnp.transpose(x, (1, 0, 2)).reshape(sz_b, L, n_head, d_k)
        return jnp.transpose(x, (0, 2, 1, 3)).reshape(sz_b * n_head, L, d_k)

    qh, kh, vh = split_heads(q, len_q), split_heads(k, len_k), split_heads(v, len_k)
    s = jnp.einsum("bqd,bkd->bqk", qh, kh) / (float(d_k) ** 0.5)
    s = jnp.where(mask_rep, -1e9, s)
    p = jax.nn.softmax(s, axis=-1)
    out = jnp.einsum("bqk,bkd->bqd", p, vh)
    out = out.reshape(n_head, sz_b, len_q, d_k)
    out = jnp.transpose(out, (1, 2, 0, 3)).reshape(sz_b, len_q, d_model)
    out = out @ params["fc_w"].T + params["fc_b"]
    out = jnp.transpose(out, (1, 0, 2)) + residual
    mean = jnp.mean(out, axis=-1, keepdims=True)
    var = jnp.mean(jnp.square(out - mean), axis=-1, keepdims=True)
    out = (out - mean) / jnp.sqrt(var + 1e-5) * params["ln_g"] + params["ln_b"]
    return out, p


if __name__ == "__main__":
    n_head, d_model = 4, 32
    d_k = d_model // n_head
    sz_b, len_q, len_k = 2, 8, 8

    key = jax.random.PRNGKey(0)
    key_q, key_k, key_v, key_m, key_w, key_b = jax.random.split(key, 6)

    q = jax.random.normal(key_q, (len_q, sz_b, d_model), jnp.float32)
    k = jax.random.normal(key_k, (len_k, sz_b, d_model), jnp.float32)
    v = jax.random.normal(key_v, (len_k, sz_b, d_model), jnp.float32)
    mask = jax.random.bernoulli(key_m, 0.2, (sz_b, len_q, len_k))

    # deterministic parameter init (fc: xavier_normal; LayerNorm: ones/zeros)
    xavier_std = (2.0 / (d_model + d_model)) ** 0.5
    params = {
        "n_head": n_head,
        "d_k": d_k,
        "fc_w": jax.random.normal(key_w, (d_model, d_model), jnp.float32) * xavier_std,
        "fc_b": jax.random.uniform(key_b, (d_model,), jnp.float32,
                                   -1.0 / d_model ** 0.5, 1.0 / d_model ** 0.5),
        "ln_g": jnp.ones((d_model,), jnp.float32),
        "ln_b": jnp.zeros((d_model,), jnp.float32),
    }

    ref_out, ref_attn = reference(params, q, k, v, mask)

    # float32 MXU operands: exact module numerics (attn returned).
    out, attn = multi_head_attention(params, q, k, v, mask)
    out = jax.block_until_ready(out)
    attn = jax.block_until_ready(attn)
    assert out.shape == (len_q, sz_b, d_model)
    assert attn.shape == (sz_b * n_head, len_q, len_k)
    assert jnp.allclose(out, ref_out, rtol=1e-4, atol=1e-4)
    assert jnp.allclose(attn, ref_attn, rtol=1e-4, atol=1e-4)

    # attn-free fast path (the Encoder never consumes attn when RNN_Dec=False):
    # drops the dominant HBM write of kernel 1 entirely.
    out_na, attn_na = multi_head_attention(params, q, k, v, mask,
                                           return_attn=False)
    out_na = jax.block_until_ready(out_na)
    assert attn_na is None
    assert jnp.allclose(out_na, ref_out, rtol=1e-4, atol=1e-4)

    # bfloat16 MXU-operand path (valid on v5e/v6e/v7x): operands are cast at
    # the pallas_call boundary; softmax / LayerNorm statistics and the
    # residual stay float32 -> loose tolerance against the f32 reference.
    out16, attn16 = multi_head_attention(params, q, k, v, mask,
                                         compute_dtype=jnp.bfloat16)
    out16 = jax.block_until_ready(out16)
    attn16 = jax.block_until_ready(attn16)
    assert jnp.allclose(out16, ref_out, rtol=1e-1, atol=1e-1)
    assert jnp.allclose(attn16, ref_attn, rtol=5e-2, atol=5e-2)

    print("KERNEL_OK")
</pallas_src>

<mosaic_0001>
module attributes {stable_mosaic.version = 11 : i64} {
  func.func @kernel(%arg0: i32, %arg1: i32, %arg2: memref<1x8x32xf32, #tpu.memory_space<vmem>>, %arg3: memref<1x8x32xf32, #tpu.memory_space<vmem>>, %arg4: memref<1x8x32xf32, #tpu.memory_space<vmem>>, %arg5: memref<2x8x8xi8, #tpu.memory_space<vmem>>, %arg6: memref<1x8x32xf32, #tpu.memory_space<vmem>>, %arg7: memref<1x4x8x8xf32, #tpu.memory_space<vmem>>) attributes {dimension_semantics = [#tpu.dimension_semantics<parallel>, #tpu.dimension_semantics<parallel>], iteration_bounds = array<i64: 2, 1>, scalar_prefetch = 0 : i64, scratch_operands = 0 : i64, tpu.core_type = #tpu.core_type<tc>, window_params = [{transform_indices = @transform_0, window_bounds = array<i64: 1, 8, 32>}, {transform_indices = @transform_1, window_bounds = array<i64: 1, 8, 32>}, {transform_indices = @transform_2, window_bounds = array<i64: 1, 8, 32>}, {transform_indices = @transform_3, window_bounds = array<i64: 2, 8, 8>}, {transform_indices = @transform_4, window_bounds = array<i64: 1, 8, 32>}, {transform_indices = @transform_5, window_bounds = array<i64: 1, 4, 8, 8>}]} {
    %c0 = arith.constant 0 : index
    %c0_0 = arith.constant 0 : index
    %c0_1 = arith.constant 0 : index
    %0 = vector.load %arg2[%c0, %c0_0, %c0_1] : memref<1x8x32xf32, #tpu.memory_space<vmem>>, vector<1x8x32xf32>
    %1 = vector.shape_cast %0 : vector<1x8x32xf32> to vector<8x32xf32>
    %cst = arith.constant 0.353553385 : f32
    %2 = vector.broadcast %cst : f32 to vector<8x32xf32>
    %3 = arith.mulf %1, %2 : vector<8x32xf32>
    %c0_2 = arith.constant 0 : index
    %c0_3 = arith.constant 0 : index
    %c0_4 = arith.constant 0 : index
    %4 = vector.load %arg3[%c0_2, %c0_3, %c0_4] : memref<1x8x32xf32, #tpu.memory_space<vmem>>, vector<1x8x32xf32>
    %5 = vector.shape_cast %4 : vector<1x8x32xf32> to vector<8x32xf32>
    %c0_5 = arith.constant 0 : index
    %c0_6 = arith.constant 0 : index
    %c0_7 = arith.constant 0 : index
    %6 = vector.load %arg4[%c0_5, %c0_6, %c0_7] : memref<1x8x32xf32, #tpu.memory_space<vmem>>, vector<1x8x32xf32>
    %7 = vector.shape_cast %6 : vector<1x8x32xf32> to vector<8x32xf32>
    %8 = vector.extract_strided_slice %3 {offsets = [0, 0], sizes = [8, 8], strides = [1, 1]} : vector<8x32xf32> to vector<8x8xf32>
    %9 = vector.extract_strided_slice %5 {offsets = [0, 0], sizes = [8, 8], strides = [1, 1]} : vector<8x32xf32> to vector<8x8xf32>
    %10 = vector.extract_strided_slice %7 {offsets = [0, 0], sizes = [8, 8], strides = [1, 1]} : vector<8x32xf32> to vector<8x8xf32>
    %c4_i32 = arith.constant 4 : i32
    %11 = arith.muli %arg0, %c4_i32 : i32
    %c0_i32 = arith.constant 0 : i32
    %12 = arith.addi %11, %c0_i32 : i32
    %c2_i32 = arith.constant 2 : i32
    %c0_i32_8 = arith.constant 0 : i32
    %13 = arith.cmpi eq, %c2_i32, %c0_i32_8 : i32
    %c1_i32 = arith.constant 1 : i32
    %14 = arith.select %13, %c1_i32, %c2_i32 : i32
    %15 = arith.remsi %12, %14 : i32
    %c0_i32_9 = arith.constant 0 : i32
    %16 = arith.cmpi ne, %15, %c0_i32_9 : i32
    %c0_i32_10 = arith.constant 0 : i32
    %17 = arith.cmpi slt, %15, %c0_i32_10 : i32
    %c0_i32_11 = arith.constant 0 : i32
    %18 = arith.cmpi slt, %14, %c0_i32_11 : i32
    %19 = arith.xori %17, %18 : i1
    %20 = arith.andi %19, %16 : i1
    %21 = arith.addi %15, %14 : i32
    %22 = arith.select %20, %21, %15 : i32
    %23 = arith.index_cast %22 : i32 to index
    %c0_12 = arith.constant 0 : index
    %c0_13 = arith.constant 0 : index
    %24 = vector.load %arg5[%23, %c0_12, %c0_13] : memref<2x8x8xi8, #tpu.memory_space<vmem>>, vector<1x8x8xi8>
    %25 = vector.shape_cast %24 : vector<1x8x8xi8> to vector<8x8xi8>
    %cst_14 = arith.constant dense<0.000000e+00> : vector<8x8xf32>
    %26 = tpu.matmul %8, %9, %cst_14 {dimension_numbers = #tpu.dot_dimension_numbers<[1], [1], [0], [0], [0, 0, 1, 0], [], []>} : vector<8x8xf32>, vector<8x8xf32>, vector<8x8xf32> -> vector<8x8xf32>
    %c0_i8 = arith.constant 0 : i8
    %27 = vector.broadcast %c0_i8 : i8 to vector<8x8xi8>
    %28 = arith.cmpi ne, %25, %27 : vector<8x8xi8>
    %cst_15 = arith.constant -1.000000e+09 : f32
    %29 = vector.broadcast %cst_15 : f32 to vector<8x8xf32>
    %30 = arith.select %28, %29, %26 : vector<8x8xi1>, vector<8x8xf32>
    %cst_16 = arith.constant dense<0xFF800000> : vector<8xf32>
    %31 = vector.multi_reduction <maximumf>, %30, %cst_16 [1] : vector<8x8xf32> to vector<8xf32>
    %32 = vector.shape_cast %31 : vector<8xf32> to vector<8x1xf32>
    %33 = vector.broadcast %32 : vector<8x1xf32> to vector<8x8xf32>
    %34 = arith.subf %30, %33 : vector<8x8xf32>
    %35 = math.exp %34 : vector<8x8xf32>
    %cst_17 = arith.constant dense<0.000000e+00> : vector<8xf32>
    %36 = vector.multi_reduction <add>, %35, %cst_17 [1] : vector<8x8xf32> to vector<8xf32>
    %37 = vector.shape_cast %36 : vector<8xf32> to vector<8x1xf32>
    %38 = tpu.reciprocal %37 : vector<8x1xf32> -> vector<8x1xf32>
    %39 = vector.broadcast %38 : vector<8x1xf32> to vector<8x8xf32>
    %40 = arith.mulf %35, %39 : vector<8x8xf32>
    %c0_18 = arith.constant 0 : index
    %c0_19 = arith.constant 0 : index
    %c0_20 = arith.constant 0 : index
    %c0_21 = arith.constant 0 : index
    %41 = vector.load %arg7[%c0_18, %c0_19, %c0_20, %c0_21] : memref<1x4x8x8xf32, #tpu.memory_space<vmem>>, vector<1x1x8x8xf32>
    %42 = vector.shape_cast %41 : vector<1x1x8x8xf32> to vector<8x8xf32>
    %43 = vector.shape_cast %40 : vector<8x8xf32> to vector<1x1x8x8xf32>
    tpu.vector_store %arg7[%c0_18, %c0_19, %c0_20, %c0_21], %43 {strides = array<i32>} : memref<1x4x8x8xf32, #tpu.memory_space<vmem>>, vector<1x1x8x8xf32>,
    %cst_22 = arith.constant dense<0.000000e+00> : vector<8x8xf32>
    %44 = tpu.matmul %40, %10, %cst_22 {dimension_numbers = #tpu.dot_dimension_numbers<[1], [0], [0], [1], [0, 0, 1, 1], [], []>} : vector<8x8xf32>, vector<8x8xf32>, vector<8x8xf32> -> vector<8x8xf32>
    %c0_23 = arith.constant 0 : index
    %c0_24 = arith.constant 0 : index
    %c0_25 = arith.constant 0 : index
    %45 = vector.load %arg6[%c0_23, %c0_24, %c0_25] : memref<1x8x32xf32, #tpu.memory_space<vmem>>, vector<1x8x8xf32>
    %46 = vector.shape_cast %45 : vector<1x8x8xf32> to vector<8x8xf32>
    %47 = vector.shape_cast %44 : vector<8x8xf32> to vector<1x8x8xf32>
    tpu.vector_store %arg6[%c0_23, %c0_24, %c0_25], %47 {strides = array<i32>} : memref<1x8x32xf32, #tpu.memory_space<vmem>>, vector<1x8x8xf32>,
    %48 = vector.extract_strided_slice %3 {offsets = [0, 8], sizes = [8, 8], strides = [1, 1]} : vector<8x32xf32> to vector<8x8xf32>
    %49 = vector.extract_strided_slice %5 {offsets = [0, 8], sizes = [8, 8], strides = [1, 1]} : vector<8x32xf32> to vector<8x8xf32>
    %50 = vector.extract_strided_slice %7 {offsets = [0, 8], sizes = [8, 8], strides = [1, 1]} : vector<8x32xf32> to vector<8x8xf32>
    %c4_i32_26 = arith.constant 4 : i32
    %51 = arith.muli %arg0, %c4_i32_26 : i32
    %c1_i32_27 = arith.constant 1 : i32
    %52 = arith.addi %51, %c1_i32_27 : i32
    %c2_i32_28 = arith.constant 2 : i32
    %c0_i32_29 = arith.constant 0 : i32
    %53 = arith.cmpi eq, %c2_i32_28, %c0_i32_29 : i32
    %c1_i32_30 = arith.constant 1 : i32
    %54 = arith.select %53, %c1_i32_30, %c2_i32_28 : i32
    %55 = arith.remsi %52, %54 : i32
    %c0_i32_31 = arith.constant 0 : i32
    %56 = arith.cmpi ne, %55, %c0_i32_31 : i32
    %c0_i32_32 = arith.constant 0 : i32
    %57 = arith.cmpi slt, %55, %c0_i32_32 : i32
    %c0_i32_33 = arith.constant 0 : i32
    %58 = arith.cmpi slt, %54, %c0_i32_33 : i32
    %59 = arith.xori %57, %58 : i1
    %60 = arith.andi %59, %56 : i1
    %61 = arith.addi %55, %54 : i32
    %62 = arith.select %60, %61, %55 : i32
    %63 = arith.index_cast %62 : i32 to index
    %c0_34 = arith.constant 0 : index
    %c0_35 = arith.constant 0 : index
    %64 = vector.load %arg5[%63, %c0_34, %c0_35] : memref<2x8x8xi8, #tpu.memory_space<vmem>>, vector<1x8x8xi8>
    %65 = vector.shape_cast %64 : vector<1x8x8xi8> to vector<8x8xi8>
    %cst_36 = arith.constant dense<0.000000e+00> : vector<8x8xf32>
    %66 = tpu.matmul %48, %49, %cst_36 {dimension_numbers = #tpu.dot_dimension_numbers<[1], [1], [0], [0], [0, 0, 1, 0], [], []>} : vector<8x8xf32>, vector<8x8xf32>, vector<8x8xf32> -> vector<8x8xf32>
    %c0_i8_37 = arith.constant 0 : i8
    %67 = vector.broadcast %c0_i8_37 : i8 to vector<8x8xi8>
    %68 = arith.cmpi ne, %65, %67 : vector<8x8xi8>
    %cst_38 = arith.constant -1.000000e+09 : f32
    %69 = vector.broadcast %cst_38 : f32 to vector<8x8xf32>
    %70 = arith.select %68, %69, %66 : vector<8x8xi1>, vector<8x8xf32>
    %cst_39 = arith.constant dense<0xFF800000> : vector<8xf32>
    %71 = vector.multi_reduction <maximumf>, %70, %cst_39 [1] : vector<8x8xf32> to vector<8xf32>
    %72 = vector.shape_cast %71 : vector<8xf32> to vector<8x1xf32>
    %73 = vector.broadcast %72 : vector<8x1xf32> to vector<8x8xf32>
    %74 = arith.subf %70, %73 : vector<8x8xf32>
    %75 = math.exp %74 : vector<8x8xf32>
    %cst_40 = arith.constant dense<0.000000e+00> : vector<8xf32>
    %76 = vector.multi_reduction <add>, %75, %cst_40 [1] : vector<8x8xf32> to vector<8xf32>
    %77 = vector.shape_cast %76 : vector<8xf32> to vector<8x1xf32>
    %78 = tpu.reciprocal %77 : vector<8x1xf32> -> vector<8x1xf32>
    %79 = vector.broadcast %78 : vector<8x1xf32> to vector<8x8xf32>
    %80 = arith.mulf %75, %79 : vector<8x8xf32>
    %c0_41 = arith.constant 0 : index
    %c1 = arith.constant 1 : index
    %c0_42 = arith.constant 0 : index
    %c0_43 = arith.constant 0 : index
    %81 = vector.load %arg7[%c0_41, %c1, %c0_42, %c0_43] : memref<1x4x8x8xf32, #tpu.memory_space<vmem>>, vector<1x1x8x8xf32>
    %82 = vector.shape_cast %81 : vector<1x1x8x8xf32> to vector<8x8xf32>
    %83 = vector.shape_cast %80 : vector<8x8xf32> to vector<1x1x8x8xf32>
    tpu.vector_store %arg7[%c0_41, %c1, %c0_42, %c0_43], %83 {strides = array<i32>} : memref<1x4x8x8xf32, #tpu.memory_space<vmem>>, vector<1x1x8x8xf32>,
    %cst_44 = arith.constant dense<0.000000e+00> : vector<8x8xf32>
    %84 = tpu.matmul %80, %50, %cst_44 {dimension_numbers = #tpu.dot_dimension_numbers<[1], [0], [0], [1], [0, 0, 1, 1], [], []>} : vector<8x8xf32>, vector<8x8xf32>, vector<8x8xf32> -> vector<8x8xf32>
    %c0_45 = arith.constant 0 : index
    %c0_46 = arith.constant 0 : index
    %c8 = arith.constant 8 : index
    %85 = vector.load %arg6[%c0_45, %c0_46, %c8] : memref<1x8x32xf32, #tpu.memory_space<vmem>>, vector<1x8x8xf32>
    %86 = vector.shape_cast %85 : vector<1x8x8xf32> to vector<8x8xf32>
    %87 = vector.shape_cast %84 : vector<8x8xf32> to vector<1x8x8xf32>
    tpu.vector_store %arg6[%c0_45, %c0_46, %c8], %87 {strides = array<i32>} : memref<1x8x32xf32, #tpu.memory_space<vmem>>, vector<1x8x8xf32>,
    %88 = vector.extract_strided_slice %3 {offsets = [0, 16], sizes = [8, 8], strides = [1, 1]} : vector<8x32xf32> to vector<8x8xf32>
    %89 = vector.extract_strided_slice %5 {offsets = [0, 16], sizes = [8, 8], strides = [1, 1]} : vector<8x32xf32> to vector<8x8xf32>
    %90 = vector.extract_strided_slice %7 {offsets = [0, 16], sizes = [8, 8], strides = [1, 1]} : vector<8x32xf32> to vector<8x8xf32>
    %c4_i32_47 = arith.constant 4 : i32
    %91 = arith.muli %arg0, %c4_i32_47 : i32
    %c2_i32_48 = arith.constant 2 : i32
    %92 = arith.addi %91, %c2_i32_48 : i32
    %c2_i32_49 = arith.constant 2 : i32
    %c0_i32_50 = arith.constant 0 : i32
    %93 = arith.cmpi eq, %c2_i32_49, %c0_i32_50 : i32
    %c1_i32_51 = arith.constant 1 : i32
    %94 = arith.select %93, %c1_i32_51, %c2_i32_49 : i32
    %95 = arith.remsi %92, %94 : i32
    %c0_i32_52 = arith.constant 0 : i32
    %96 = arith.cmpi ne, %95, %c0_i32_52 : i32
    %c0_i32_53 = arith.constant 0 : i32
    %97 = arith.cmpi slt, %95, %c0_i32_53 : i32
    %c0_i32_54 = arith.constant 0 : i32
    %98 = arith.cmpi slt, %94, %c0_i32_54 : i32
    %99 = arith.xori %97, %98 : i1
    %100 = arith.andi %99, %96 : i1
    %101 = arith.addi %95, %94 : i32
    %102 = arith.select %100, %101, %95 : i32
    %103 = arith.index_cast %102 : i32 to index
    %c0_55 = arith.constant 0 : index
    %c0_56 = arith.constant 0 : index
    %104 = vector.load %arg5[%103, %c0_55, %c0_56] : memref<2x8x8xi8, #tpu.memory_space<vmem>>, vector<1x8x8xi8>
    %105 = vector.shape_cast %104 : vector<1x8x8xi8> to vector<8x8xi8>
    %cst_57 = arith.constant dense<0.000000e+00> : vector<8x8xf32>
    %106 = tpu.matmul %88, %89, %cst_57 {dimension_numbers = #tpu.dot_dimension_numbers<[1], [1], [0], [0], [0, 0, 1, 0], [], []>} : vector<8x8xf32>, vector<8x8xf32>, vector<8x8xf32> -> vector<8x8xf32>
    %c0_i8_58 = arith.constant 0 : i8
    %107 = vector.broadcast %c0_i8_58 : i8 to vector<8x8xi8>
    %108 = arith.cmpi ne, %105, %107 : vector<8x8xi8>
    %cst_59 = arith.constant -1.000000e+09 : f32
    %109 = vector.broadcast %cst_59 : f32 to vector<8x8xf32>
    %110 = arith.select %108, %109, %106 : vector<8x8xi1>, vector<8x8xf32>
    %cst_60 = arith.constant dense<0xFF800000> : vector<8xf32>
    %111 = vector.multi_reduction <maximumf>, %110, %cst_60 [1] : vector<8x8xf32> to vector<8xf32>
    %112 = vector.shape_cast %111 : vector<8xf32> to vector<8x1xf32>
    %113 = vector.broadcast %112 : vector<8x1xf32> to vector<8x8xf32>
    %114 = arith.subf %110, %113 : vector<8x8xf32>
    %115 = math.exp %114 : vector<8x8xf32>
    %cst_61 = arith.constant dense<0.000000e+00> : vector<8xf32>
    %116 = vector.multi_reduction <add>, %115, %cst_61 [1] : vector<8x8xf32> to vector<8xf32>
    %117 = vector.shape_cast %116 : vector<8xf32> to vector<8x1xf32>
    %118 = tpu.reciprocal %117 : vector<8x1xf32> -> vector<8x1xf32>
    %119 = vector.broadcast %118 : vector<8x1xf32> to vector<8x8xf32>
    %120 = arith.mulf %115, %119 : vector<8x8xf32>
    %c0_62 = arith.constant 0 : index
    %c2 = arith.constant 2 : index
    %c0_63 = arith.constant 0 : index
    %c0_64 = arith.constant 0 : index
    %121 = vector.load %arg7[%c0_62, %c2, %c0_63, %c0_64] : memref<1x4x8x8xf32, #tpu.memory_space<vmem>>, vector<1x1x8x8xf32>
    %122 = vector.shape_cast %121 : vector<1x1x8x8xf32> to vector<8x8xf32>
    %123 = vector.shape_cast %120 : vector<8x8xf32> to vector<1x1x8x8xf32>
    tpu.vector_store %arg7[%c0_62, %c2, %c0_63, %c0_64], %123 {strides = array<i32>} : memref<1x4x8x8xf32, #tpu.memory_space<vmem>>, vector<1x1x8x8xf32>,
    %cst_65 = arith.constant dense<0.000000e+00> : vector<8x8xf32>
    %124 = tpu.matmul %120, %90, %cst_65 {dimension_numbers = #tpu.dot_dimension_numbers<[1], [0], [0], [1], [0, 0, 1, 1], [], []>} : vector<8x8xf32>, vector<8x8xf32>, vector<8x8xf32> -> vector<8x8xf32>
    %c0_66 = arith.constant 0 : index
    %c0_67 = arith.constant 0 : index
    %c16 = arith.constant 16 : index
    %125 = vector.load %arg6[%c0_66, %c0_67, %c16] : memref<1x8x32xf32, #tpu.memory_space<vmem>>, vector<1x8x8xf32>
    %126 = vector.shape_cast %125 : vector<1x8x8xf32> to vector<8x8xf32>
    %127 = vector.shape_cast %124 : vector<8x8xf32> to vector<1x8x8xf32>
    tpu.vector_store %arg6[%c0_66, %c0_67, %c16], %127 {strides = array<i32>} : memref<1x8x32xf32, #tpu.memory_space<vmem>>, vector<1x8x8xf32>,
    %128 = vector.extract_strided_slice %3 {offsets = [0, 24], sizes = [8, 8], strides = [1, 1]} : vector<8x32xf32> to vector<8x8xf32>
    %129 = vector.extract_strided_slice %5 {offsets = [0, 24], sizes = [8, 8], strides = [1, 1]} : vector<8x32xf32> to vector<8x8xf32>
    %130 = vector.extract_strided_slice %7 {offsets = [0, 24], sizes = [8, 8], strides = [1, 1]} : vector<8x32xf32> to vector<8x8xf32>
    %c4_i32_68 = arith.constant 4 : i32
    %131 = arith.muli %arg0, %c4_i32_68 : i32
    %c3_i32 = arith.constant 3 : i32
    %132 = arith.addi %131, %c3_i32 : i32
    %c2_i32_69 = arith.constant 2 : i32
    %c0_i32_70 = arith.constant 0 : i32
    %133 = arith.cmpi eq, %c2_i32_69, %c0_i32_70 : i32
    %c1_i32_71 = arith.constant 1 : i32
    %134 = arith.select %133, %c1_i32_71, %c2_i32_69 : i32
    %135 = arith.remsi %132, %134 : i32
    %c0_i32_72 = arith.constant 0 : i32
    %136 = arith.cmpi ne, %135, %c0_i32_72 : i32
    %c0_i32_73 = arith.constant 0 : i32
    %137 = arith.cmpi slt, %135, %c0_i32_73 : i32
    %c0_i32_74 = arith.constant 0 : i32
    %138 = arith.cmpi slt, %134, %c0_i32_74 : i32
    %139 = arith.xori %137, %138 : i1
    %140 = arith.andi %139, %136 : i1
    %141 = arith.addi %135, %134 : i32
    %142 = arith.select %140, %141, %135 : i32
    %143 = arith.index_cast %142 : i32 to index
    %c0_75 = arith.constant 0 : index
    %c0_76 = arith.constant 0 : index
    %144 = vector.load %arg5[%143, %c0_75, %c0_76] : memref<2x8x8xi8, #tpu.memory_space<vmem>>, vector<1x8x8xi8>
    %145 = vector.shape_cast %144 : vector<1x8x8xi8> to vector<8x8xi8>
    %cst_77 = arith.constant dense<0.000000e+00> : vector<8x8xf32>
    %146 = tpu.matmul %128, %129, %cst_77 {dimension_numbers = #tpu.dot_dimension_numbers<[1], [1], [0], [0], [0, 0, 1, 0], [], []>} : vector<8x8xf32>, vector<8x8xf32>, vector<8x8xf32> -> vector<8x8xf32>
    %c0_i8_78 = arith.constant 0 : i8
    %147 = vector.broadcast %c0_i8_78 : i8 to vector<8x8xi8>
    %148 = arith.cmpi ne, %145, %147 : vector<8x8xi8>
    %cst_79 = arith.constant -1.000000e+09 : f32
    %149 = vector.broadcast %cst_79 : f32 to vector<8x8xf32>
    %150 = arith.select %148, %149, %146 : vector<8x8xi1>, vector<8x8xf32>
    %cst_80 = arith.constant dense<0xFF800000> : vector<8xf32>
    %151 = vector.multi_reduction <maximumf>, %150, %cst_80 [1] : vector<8x8xf32> to vector<8xf32>
    %152 = vector.shape_cast %151 : vector<8xf32> to vector<8x1xf32>
    %153 = vector.broadcast %152 : vector<8x1xf32> to vector<8x8xf32>
    %154 = arith.subf %150, %153 : vector<8x8xf32>
    %155 = math.exp %154 : vector<8x8xf32>
    %cst_81 = arith.constant dense<0.000000e+00> : vector<8xf32>
    %156 = vector.multi_reduction <add>, %155, %cst_81 [1] : vector<8x8xf32> to vector<8xf32>
    %157 = vector.shape_cast %156 : vector<8xf32> to vector<8x1xf32>
    %158 = tpu.reciprocal %157 : vector<8x1xf32> -> vector<8x1xf32>
    %159 = vector.broadcast %158 : vector<8x1xf32> to vector<8x8xf32>
    %160 = arith.mulf %155, %159 : vector<8x8xf32>
    %c0_82 = arith.constant 0 : index
    %c3 = arith.constant 3 : index
    %c0_83 = arith.constant 0 : index
    %c0_84 = arith.constant 0 : index
    %161 = vector.load %arg7[%c0_82, %c3, %c0_83, %c0_84] : memref<1x4x8x8xf32, #tpu.memory_space<vmem>>, vector<1x1x8x8xf32>
    %162 = vector.shape_cast %161 : vector<1x1x8x8xf32> to vector<8x8xf32>
    %163 = vector.shape_cast %160 : vector<8x8xf32> to vector<1x1x8x8xf32>
    tpu.vector_store %arg7[%c0_82, %c3, %c0_83, %c0_84], %163 {strides = array<i32>} : memref<1x4x8x8xf32, #tpu.memory_space<vmem>>, vector<1x1x8x8xf32>,
    %cst_85 = arith.constant dense<0.000000e+00> : vector<8x8xf32>
    %164 = tpu.matmul %160, %130, %cst_85 {dimension_numbers = #tpu.dot_dimension_numbers<[1], [0], [0], [1], [0, 0, 1, 1], [], []>} : vector<8x8xf32>, vector<8x8xf32>, vector<8x8xf32> -> vector<8x8xf32>
    %c0_86 = arith.constant 0 : index
    %c0_87 = arith.constant 0 : index
    %c24 = arith.constant 24 : index
    %165 = vector.load %arg6[%c0_86, %c0_87, %c24] : memref<1x8x32xf32, #tpu.memory_space<vmem>>, vector<1x8x8xf32>
    %166 = vector.shape_cast %165 : vector<1x8x8xf32> to vector<8x8xf32>
    %167 = vector.shape_cast %164 : vector<8x8xf32> to vector<1x8x8xf32>
    tpu.vector_store %arg6[%c0_86, %c0_87, %c24], %167 {strides = array<i32>} : memref<1x8x32xf32, #tpu.memory_space<vmem>>, vector<1x8x8xf32>,
    return
  }
  func.func @transform_0(%arg0: i32, %arg1: i32) -> (i32, i32, i32) {
    %c0_i32 = arith.constant 0 : i32
    %c0_i32_0 = arith.constant 0 : i32
    return %arg0, %arg1, %c0_i32 : i32, i32, i32
  }
  func.func @transform_1(%arg0: i32, %arg1: i32) -> (i32, i32, i32) {
    %c0_i32 = arith.constant 0 : i32
    %c0_i32_0 = arith.constant 0 : i32
    %c0_i32_1 = arith.constant 0 : i32
    return %arg0, %c0_i32, %c0_i32_0 : i32, i32, i32
  }
  func.func @transform_2(%arg0: i32, %arg1: i32) -> (i32, i32, i32) {
    %c0_i32 = arith.constant 0 : i32
    %c0_i32_0 = arith.constant 0 : i32
    %c0_i32_1 = arith.constant 0 : i32
    return %arg0, %c0_i32, %c0_i32_0 : i32, i32, i32
  }
  func.func @transform_3(%arg0: i32, %arg1: i32) -> (i32, i32, i32) {
    %c0_i32 = arith.constant 0 : i32
    %c0_i32_0 = arith.constant 0 : i32
    %c0_i32_1 = arith.constant 0 : i32
    return %c0_i32, %arg1, %c0_i32_0 : i32, i32, i32
  }
  func.func @transform_4(%arg0: i32, %arg1: i32) -> (i32, i32, i32) {
    %c0_i32 = arith.constant 0 : i32
    %c0_i32_0 = arith.constant 0 : i32
    return %arg0, %arg1, %c0_i32 : i32, i32, i32
  }
  func.func @transform_5(%arg0: i32, %arg1: i32) -> (i32, i32, i32, i32) {
    %c0_i32 = arith.constant 0 : i32
    %c0_i32_0 = arith.constant 0 : i32
    %c0_i32_1 = arith.constant 0 : i32
    return %arg0, %c0_i32, %arg1, %c0_i32_0 : i32, i32, i32, i32
  }
}

</mosaic_0001>

<bundles_post_ra>
// kernel: tpu_custom_call.1
= control target key start
LH: loop header
LB: loop body
LE: loop exit
PB: predicated region body
PF: predicated region fallthrough
CT: control target
= control target key end

     0   :  { %s2221_s0 = inlined_call_operand.hbm [shape: f32[2,8,32], index: 0, kind: input, shape index: {}]   ;;  %s2222_s1 = inlined_call_operand.hbm [shape: f32[2,8,32], index: 1, kind: input, shape index: {}]   ;;  %s2223_s2 = inlined_call_operand.hbm [shape: f32[2,8,32], index: 2, kind: input, shape index: {}]   ;;  %s2224_s3 = inlined_call_operand.vmem [shape: s8[2,8,8], index: 3, kind: input, shape index: {}]   ;;  %s2225_s4 = inlined_call_operand.hbm [shape: f32[2,8,32], index: 4, kind: output, shape index: {0}]   ;;  %s2226_s5 = inlined_call_operand.hbm [shape: f32[2,4,8,8], index: 5, kind: output, shape index: {1}]  }
   0x1   :  { %2238 = sst [smem:[#allocation20_spill]] %s2222_s1 }
   0x2   :  { %11 = vsyncpa [#allocation3], 0 }
   0x3   :  { %13 = vsyncpa [#allocation3 + $0x1], 0 }
   0x4   :  { %14 = vsyncpa [#allocation6], 0 }
   0x5   :  { %16 = vsyncpa [#allocation6 + $0x1], 0 }
   0x6   :  { %17 = vsyncpa [#allocation4], 0 }
   0x7   :  { %19 = vsyncpa [#allocation4 + $0x1], 0 }
   0x8   :  { %20 = vsyncpa [#allocation10], 0 }
   0x9   :  { %22 = vsyncpa [#allocation10 + $0x1], 0  ;;  %s1819_s18 = smov 0   ;;  %s1821_s19 = smov 0  }
   0xa   :  { %s1823_s20 = smov 0   ;;  %s1825_s21 = smov 0  }
   0xb   :  { %s1827_s22 = smov 0   ;;  %s1829_s23 = smov 0  }
   0xc LB: > { %2239 = sst [smem:[#allocation15_spill]] %s1768_s22  ;;  %s1850_s24 = sadd.s32 4294967295, %s1772_s23   ;;  %s1772_s23 = sphi %s1829_s23, %s28_s23   ;;  %s1768_s22 = sphi %s1827_s22, %s2267_s22   ;;  %s1764_s21 = sphi %s1825_s21, %s2266_s21   ;;  %s1760_s20 = sphi %s1823_s20, %s2270_s20   ;;  %s1756_s19 = sphi %s1821_s19, %s2269_s19   ;;  %s1752_s18 = sphi %s1819_s18, %s2268_s18  }
   0xd   : > { %2240 = sst [smem:[#allocation16_spill]] %s1772_s23  ;;  %s1349_s25 = sadd.s32 4294967294, %s1772_s23  }
   0xe   : > { %s40_s26 = sadd.s32 1, %s1768_s22  ;;  %s49_s27 = sadd.s32 1, %s1760_s20 }
   0xf   : > { %p42_p0 = scmp.ge.s32.totalorder %s40_s26, 2  ;;  %p56_p1 = scmp.ne.s32.totalorder %s1760_s20, %s1756_s19 }
  0x10   : > { %p57_p2 = scmp.eq.s32.totalorder %s1772_s23, 0  ;;  %p62_p3 = scmp.ne.s32.totalorder %s1756_s19, %s1752_s18 }
  0x11   : > { %s2272_s26 = smov (%p42_p0, %s40_s26), 0  ;;  %p63_p5 = scmp.eq.s32.totalorder %s1850_s24, 0 }
  0x12   : > { %2241 = sst [smem:[#allocation17_spill]] %s2272_s26  ;;  %p1862_p4 = por %p57_p2, %p56_p1 }
  0x13   : > { %s44_s29 = ssub.s32 %s1768_s22, %s2272_s26  ;;  %p166_p6 = scmp.eq.s32.totalorder %s1850_s24, 1 }
  0x14   : > { %p47_p7 = scmp.eq.s32.totalorder %s44_s29, 0  ;;  %p1870_p8 = por %p63_p5, %p62_p3 }
  0x15   : > { %p1874_p9 = por %p166_p6, %p56_p1  ;;  %p172_p10 = scmp.eq.s32.totalorder %s1349_s25, 1 }
  0x16   : > { %s2243_s30 = scalar_select %p1870_p8, 1, 0 }
  0x17   : > { %s2244_s6 = scalar_select %p1874_p9, 1, 0 }
  0x18   : > { %s1879_s7 = scalar_select %p47_p7, %s1760_s20, %s49_s27  }
  0x19   : > { %p1881_p11 = por %p172_p10, %p62_p3  ;;  %p1488_p13 = scmp.lt.s32.totalorder %s1772_s23, 2 }
  0x1a   : > { %2245 = sst [smem:[#allocation18_spill]] %s1879_s7  ;;  %s2227_s9 = sand.u32 1, %s1760_s20  }
  0x1b   : > { %s2246_s8 = scalar_select %p1881_p11, 1, 0 }
  0x1c   : > { %s1890_s10 = sshll.u32 %s2227_s9, 3  ;;  %s1893_s11 = sshll.u32 %s1768_s22, 7 }
  0x1d   : > { %2247 = sst [smem:[#allocation19_spill]] %s2246_s8  ;;  %p1897_p0 = pnand %p1488_p13, %p1862_p4 }
  0x1e   : > { %s246_s13 = sand.u32 1, %s1772_s23   ;;  %s2249_s1 = sld [smem:[#allocation20_spill]] }
  0x1f   : > { %s2248_s12 = scalar_select %p1897_p0, 1, 0 }
  0x20   : > { %s250_s17 = scalar_lea.vmem [#allocation5], %s1890_s10  ;;  %s1913_s27 = scalar_lea.sflag [#allocation6], %s246_s13 }
  0x21   : > { %s257_s25 = sshll.u32 %s250_s17, 4  ;;  %p1919_p4 = pneg %p1897_p0  ;;  %s1910_s25 = int_to_ptr.vmem [resolvable:$true] %s257_s25 }
  0x24   : > { %s1906_s16 = scalar_lea.hbm %s2249_s1, %s1893_s11  ;;  %s1569_s17 = scalar_lea.hbm %s2249_s1, 256 }
  0x25   : > { %s1564_s28 = scalar_lea.hbm %s1906_s16, 128  ;;  %p1570_p7 = scmp.lt.u32.totalorder %s1906_s16, %s2249_s1 }
  0x26   : > { %p1565_p3 = scmp.ne.s32.totalorder %s1906_s16, %s1564_s28  ;;  %p1571_p10 = scmp.lt.u32.totalorder %s1569_s17, %s1564_s28 }
  0x27   : > { %p1573_p12 = scmp.lt.u32.totalorder %s1564_s28, %s1906_s16 }
  0x28   : > { %p1567_p5 = pnand %p1919_p4, %p1565_p3  ;;  %p1572_p13 = por %p1571_p10, %p1570_p7 }
  0x2a   : > { %p1568_p6 = pneg %p1567_p5  ;;  %p1574_p1 = por %p1573_p12, %p1572_p13 }
  0x2c   : > { %p1575_p2 = pnand %p1574_p1, %p1568_p6 }
  0x2e   : > { %1578 = shalt.err (!%p1575_p2)
}
  0x2f   : > { %s1579_s13 = scalar_lea.vmem %s1910_s25, 128  ;;  %s1774_s14 = smov [#allocation5]  }
  0x30   : > { %p1580_p3 = scmp.ne.s32.totalorder %s1910_s25, %s1579_s13  ;;  %s1584_s15 = sshll.u32 %s1774_s14, 4  ;;  %s1585_s15 = int_to_ptr.vmem [resolvable:$false] %s1584_s15 }
  0x31   : > { %s1586_s26 = scalar_lea.vmem %s1585_s15, 256  ;;  %p1587_p9 = scmp.lt.s32.totalorder %s1910_s25, %s1585_s15 }
  0x32   : > { %p1582_p5 = pnand %p1580_p3, %p1919_p4  ;;  %p1588_p8 = scmp.lt.s32.totalorder %s1586_s26, %s1579_s13 }
  0x34   : > { %p1583_p11 = pneg %p1582_p5  ;;  %p1589_p7 = por %p1588_p8, %p1587_p9 }
  0x36   : > { %p1590_p10 = pnand %p1589_p7, %p1583_p11 }
  0x38   : > { %1593 = shalt.err (!%p1590_p10)
}
  0x39   : > { %1477 = dma.hbm_to_vmem [thread:$0]  (!%p1897_p0), %s1906_s16, 128, %s1910_s25, %s1913_s27  }
  0x3a   : > { %p2251_p12 = scmp.lt.s32.totalorder %s1772_s23, 3  ;;  %p2252_p1 = scmp.ge.s32.totalorder %s1772_s23, 1 }
  0x3b   : > { %s1955_s13 = scalar_lea.hbm %s2221_s0, %s1893_s11  ;;  %s231_s14 = scalar_lea.vmem [#allocation2], %s1890_s10 }
  0x3c   : > { %p1947_p2 = pnand %p2252_p1, %p2251_p12  ;;  %s239_s15 = sshll.u32 %s231_s14, 4  ;;  %s1958_s15 = int_to_ptr.vmem [resolvable:$true] %s239_s15 }
  0x3d   : > { %s1964_s26 = scalar_lea.hbm %s2223_s2, %s1893_s11  ;;  %s2254_s1 = sand.u32 1, %s1760_s20  }
  0x3e   : > { %s2253_s9 = scalar_select %p1947_p2, 1, 0 }
  0x3f   : > { %s228_s22 = scalar_lea.sflag [#allocation3], %s2254_s1  ;;  %s1594_s7 = scalar_lea.hbm %s1955_s13, 128 }
  0x40   : > { %p1595_p8 = scmp.ne.s32.totalorder %s1955_s13, %s1594_s7  ;;  %s1599_s23 = scalar_lea.hbm %s2221_s0, 256 }
  0x41   : > { %p1600_p6 = scmp.lt.u32.totalorder %s1955_s13, %s2221_s0  ;;  %p1601_p13 = scmp.lt.u32.totalorder %s1599_s23, %s1594_s7 }
  0x42   : > { %p1597_p9 = pnand %p1595_p8, %p1919_p4  ;;  %p1603_p5 = scmp.lt.u32.totalorder %s1594_s7, %s1955_s13 }
  0x43   : > { %p1602_p3 = por %p1601_p13, %p1600_p6 }
  0x44   : > { %p1598_p11 = pneg %p1597_p9 }
  0x45   : > { %p1604_p7 = por %p1603_p5, %p1602_p3 }
  0x47   : > { %p1605_p10 = pnand %p1604_p7, %p1598_p11 }
  0x49   : > { %1608 = shalt.err (!%p1605_p10)
}
  0x4a   : > { %s1609_s1 = scalar_lea.vmem %s1958_s15, 128  ;;  %s1775_s11 = smov [#allocation2]  }
  0x4b   : > { %p1610_p12 = scmp.ne.s32.totalorder %s1958_s15, %s1609_s1  ;;  %s1614_s16 = sshll.u32 %s1775_s11, 4  ;;  %s1615_s16 = int_to_ptr.vmem [resolvable:$false] %s1614_s16 }
  0x4c   : > { %s1616_s8 = scalar_lea.vmem %s1615_s16, 256  ;;  %p1617_p9 = scmp.lt.s32.totalorder %s1958_s15, %s1615_s16 }
  0x4d   : > { %p1612_p1 = pnand %p1610_p12, %p1919_p4  ;;  %p1618_p2 = scmp.lt.s32.totalorder %s1616_s8, %s1609_s1 }
  0x4f   : > { %p1613_p8 = pneg %p1612_p1  ;;  %p1619_p6 = por %p1618_p2, %p1617_p9 }
  0x51   : > { %p1620_p13 = pnand %p1619_p6, %p1613_p8 }
  0x53   : > { %1623 = shalt.err (!%p1620_p13)
}
  0x54   : > { %1474 = dma.hbm_to_vmem [thread:$0]  (!%p1897_p0), %s1955_s13, 128, %s1958_s15, %s228_s22  }
  0x55   : > { %s268_s23 = scalar_lea.vmem [#allocation7], %s1890_s10  ;;  %s1624_s25 = scalar_lea.hbm %s1964_s26, 128 }
  0x56   : > { %s275_s7 = sshll.u32 %s268_s23, 4  ;;  %p1625_p11 = scmp.ne.s32.totalorder %s1964_s26, %s1624_s25  ;;  %s276_s7 = int_to_ptr.vmem [resolvable:$true] %s275_s7 }
  0x57   : > { %s1629_s14 = scalar_lea.hbm %s2223_s2, 256  ;;  %p1630_p5 = scmp.lt.u32.totalorder %s1964_s26, %s2223_s2 }
  0x58   : > { %p1627_p2 = pnand %p1625_p11, %p1919_p4  ;;  %p1631_p7 = scmp.lt.u32.totalorder %s1629_s14, %s1624_s25 }
  0x59   : > { %p1633_p12 = scmp.lt.u32.totalorder %s1624_s25, %s1964_s26 }
  0x5a   : > { %p1628_p3 = pneg %p1627_p2  ;;  %p1632_p10 = por %p1631_p7, %p1630_p5 }
  0x5c   : > { %p1634_p1 = por %p1633_p12, %p1632_p10 }
  0x5e   : > { %p1635_p8 = pnand %p1634_p1, %p1628_p3 }
  0x60   : > { %1638 = shalt.err (!%p1635_p8)
}
  0x61   : > { %s1639_s22 = scalar_lea.vmem %s276_s7, 128  ;;  %s1776_s10 = smov [#allocation7]  }
  0x62   : > { %p1640_p9 = scmp.ne.s32.totalorder %s276_s7, %s1639_s22  ;;  %s1644_s13 = sshll.u32 %s1776_s10, 4  ;;  %s1645_s13 = int_to_ptr.vmem [resolvable:$false] %s1644_s13 }
  0x63   : > { %s1646_s15 = scalar_lea.vmem %s1645_s13, 256  ;;  %p1647_p11 = scmp.lt.s32.totalorder %s276_s7, %s1645_s13 }
  0x64   : > { %p1642_p6 = pnand %p1640_p9, %p1919_p4  ;;  %p1648_p2 = scmp.lt.s32.totalorder %s1646_s15, %s1639_s22 }
  0x66   : > { %p1643_p13 = pneg %p1642_p6  ;;  %p1649_p0 = por %p1648_p2, %p1647_p11 }
  0x68   : > { %p1650_p5 = pnand %p1649_p0, %p1643_p13 }
  0x6a   : > { %1653 = shalt.err (!%p1650_p5)
}
  0x6b   : > { %p2255_p7 = scmp.ne.s32.totalorder %s2248_s12, 0  ;;  %p2256_p3 = scmp.ne.s32.totalorder %s2253_s9, 0 }
  0x6c   : > { %s2011_s29 = sand.u32 (!%p2256_p3), 1, %s1756_s19   ;;  %p2257_p0 = scmp.ne.s32.totalorder (!%p2256_p3), %s2243_s30, 0 }
  0x6d   : > { %1480 = dma.hbm_to_vmem [thread:$0]  (!%p2255_p7), %s1964_s26, 128, %s276_s7, %s1913_s27  }
  0x6e   : > { %284 = sbr.rel (%p2256_p3) target bundleno = 1579 (0x62b), region = 36  ;;  %s2014_s16 = sshll.u32 (!%p2256_p3), %s2011_s29, 3 }
  0x6f   : > { %s287_s8 = scalar_lea.sflag (!%p2256_p3), [#allocation3], %s2011_s29  ;;  %s290_s23 = scalar_lea.vmem (!%p2256_p3), [#allocation2], %s2014_s16 }
  0x75   : > { %1735 = dma.done.wait (%p2257_p0), %s287_s8, 128  }
  0x76   : > { %1737 = vsyncadd (%p2257_p0), %s287_s8, 4294967168  ;;  %s295_s12 = sand.u32 1, %s1850_s24   ;;  %s299_s9 = scalar_lea.vmem [#allocation5], %s2014_s16 }
  0x77   : > { %s296_s27 = scalar_lea.sflag [#allocation6], %s295_s12 }
  0x78   : > { %1739 = dma.done.wait (%p2257_p0), %s296_s27, 256  }
  0x79   : > { %1741 = vsyncadd (%p2257_p0), %s296_s27, 4294967040  ;;  %v1777_v0 = vmov 0.0   ;;  %vm1778_vm0 = vmmov 0   ;;  %vm380_vm1 = vcmask 64512   ;;  %v362_v1 = vld [vmem:[%s299_s9] sm:$0xff]  ;;  %v360_v2 = vld [vmem:[%s290_s23] sm:$0xff] }
  0x7a   : > { %1421 = vmatprep.subr.mxu0 %v1777_v0  ;;  %1423 = vmatprep.mubr.msk.f32.mxu0 %vm1778_vm0, %v1777_v0  ;;  %v361_v3 = vmul.f32 0.35355338, %v360_v2  ;;  %s2040_s24 = sshll.u32 %s1764_s21, 2  ;;  %v1779_v5 = vmov 0   ;;  %s2237_s22 = smov 120  }
  0x7b   : > { %1426 = vmatprep.subr.mxu1 %v1777_v0  ;;  %1428 = vmatprep.mubr.msk.f32.mxu1 %vm1778_vm0, %v1777_v0  ;;  %s366_s30 = ssub.s32 0, %s2040_s24  ;;  %p365_p4 = scmp.lt.s32.totalorder %s2040_s24, 0 }
  0x7c   : > { %1422 = vmatpush3.xpose.msk.msra.mxu0 %vm380_vm1, %v362_v1  ;;  %s1366_s26 = smin.u32 %s2040_s24, %s366_s30  ;;  %566 = vrot.lane.b32.xlu1 %v362_v1, %s2237_s22  ;;  %s1781_s10 = smov 112  }
  0x7d   : > { %1436 = vmatprep.subr.mxu0 %v1777_v0  ;;  %s368_s7 = sand.u32 1, %s1366_s26   ;;  %s2236_s13 = smov 104  }
  0x7e   : > { %s369_s25 = ssub.s32 0, %s368_s7  ;;  %s308_s15 = scalar_lea.vmem [#allocation7], %s2014_s16 }
  0x7f   : > { %1424 = vmatmul.mubr.msk.f32.vlgmr.msra.gmra.mrb[0].mxu0 %vm380_vm1, %v361_v3  ;;  %s2274_s25 = smov (!%p365_p4, %s369_s25), %s368_s7  ;;  %v2057_v17 = vld [vmem:[%s308_s15] sm:$0xff]  ;;  %s1364_s8 = sshll.u32 %s2011_s29, 5 }
  0x80   : > { %1438 = vmatprep.mubr.msk.f32.mxu0 %vm1778_vm0, %v1777_v0  ;;  %p1368_p10 = scmp.lt.s32.totalorder %s2274_s25, 0  ;;  %s375_s28 = sadd.s32 2, %s2274_s25  ;;  %564 = vrot.lane.b32.xlu1 %v361_v3, %s2237_s22 }
  0x81   : > { %1427 = vmatpush3.msra.mxu1 %v2057_v17  ;;  %s2063_s23 = scalar_lea.vmem [#allocation9], %s1364_s8  ;;  %s548_s12 = sadd.s32 1, %s2040_s24 }
  0x82   : > { %s2276_s28 = smov (!%p1368_p10, %s375_s28), %s2274_s25  ;;  %1431 = vmatprep.subr.mxu1 %v1777_v0  ;;  %s550_s27 = ssub.s32 0, %s548_s12 }
  0x83   : > { %s1369_s17 = sshll.u32 %s2276_s28, 1  ;;  %s1373_s9 = smin.u32 %s550_s27, %s548_s12 }
  0x84   : > { %s378_s11 = scalar_lea.vmem %s2224_s3, %s1369_s17  ;;  %759 = vrot.lane.b32.xlu1 %v361_v3, %s1781_s10  ;;  %s743_s30 = sadd.s32 2, %s2040_s24 }
  0x85   : > { %v379_v4 = vld [vmem:[%s378_s11] sm:$0x3]  ;;  %s552_s26 = sand.u32 1, %s1373_s9   ;;  %p549_p12 = scmp.lt.s32.totalorder %s548_s12, 0 }
  0x86   : > { %vm457_vm2 = vnez %v379_v4  ;;  %s745_s7 = ssub.s32 0, %s743_s30  ;;  %s553_s25 = ssub.s32 0, %s552_s26 }
  0x87   : > { %v458_v6 = vsel %vm457_vm2, 16843009, %v1779_v5  ;;  %s937_s28 = sadd.s32 3, %s2040_s24  ;;  %s1381_s17 = smin.u32 %s745_s7, %s743_s30 }
  0x88   : > { %v459_v7 = vunpack.c.0.s8 %v458_v6  ;;  %955 = vrot.lane.b32.xlu1 %v362_v1, %s2236_s13  ;;  %s2278_s25 = smov (!%p549_p12, %s553_s25), %s552_s26  ;;  %s939_s14 = ssub.s32 0, %s937_s28 }
  0x89   : > { %s747_s1 = sand.u32 1, %s1381_s17   ;;  %p744_p1 = scmp.lt.s32.totalorder %s743_s30, 0 }
  0x8a   : > { %vm460_vm3 = vcmp.ne.s32.totalorder %v459_v7, 0  ;;  %s1389_s11 = smin.u32 %s939_s14, %s937_s28  ;;  %s748_s15 = ssub.s32 0, %s747_s1 }
  0x8b   : > { %p1375_p8 = scmp.lt.s32.totalorder %s2278_s25, 0  ;;  %s559_s8 = sadd.s32 2, %s2278_s25 }
  0x8c   : > { %953 = vrot.lane.b32.xlu1 %v361_v3, %s2236_s13  ;;  %s941_s13 = sand.u32 1, %s1389_s11   ;;  %s2280_s15 = smov (!%p744_p1, %s748_s15), %s747_s1 }
  0x8d   : > { %p938_p9 = scmp.lt.s32.totalorder %s937_s28, 0  ;;  %s942_s22 = ssub.s32 0, %s941_s13 }
  0x8e   : > { %s2282_s8 = smov (!%p1375_p8, %s559_s8), %s2278_s25  ;;  %p1383_p6 = scmp.lt.s32.totalorder %s2280_s15, 0 }
  0x8f   : > { %s754_s27 = sadd.s32 2, %s2280_s15  ;;  %s2284_s22 = smov (!%p938_p9, %s942_s22), %s941_s13 }
  0x90   : > { %s2286_s27 = smov (!%p1383_p6, %s754_s27), %s2280_s15  ;;  %s1376_s12 = sshll.u32 %s2282_s8, 1 }
  0x91   : > { %p1391_p13 = scmp.lt.s32.totalorder %s2284_s22, 0  ;;  %s948_s24 = sadd.s32 2, %s2284_s22 }
  0x92   : > { %s562_s30 = scalar_lea.vmem %s2224_s3, %s1376_s12  ;;  %s1384_s7 = sshll.u32 %s2286_s27, 1 }
  0x93   : > { %s2288_s24 = smov (!%p1391_p13, %s948_s24), %s2284_s22  ;;  %v563_v27 = vld [vmem:[%s562_s30] sm:$0x3]  ;;  %s757_s28 = scalar_lea.vmem %s2224_s3, %s1384_s7 }
  0x94   : > { %s1392_s25 = sshll.u32 %s2288_s24, 1  ;;  %vm642_vm4 = vnez %v563_v27  ;;  %v758_v28 = vld [vmem:[%s757_s28] sm:$0x3]  ;;  %s2097_s22 = scalar_lea.vmem [#allocation8], %s2014_s16 }
  0x95   : > { %s951_s11 = scalar_lea.vmem %s2224_s3, %s1392_s25  ;;  %v643_v29 = vsel %vm642_vm4, 16843009, %v1779_v5  ;;  %vm837_vm5 = vnez %v758_v28  ;;  %s2258_s16 = smov 120  }
  0x96   : > { %v952_v30 = vld [vmem:[%s951_s11] sm:$0x3]  ;;  %v644_v31 = vunpack.c.0.s8 %v643_v29  ;;  %v838_v32 = vsel %vm837_vm5, 16843009, %v1779_v5  ;;  %s2259_s15 = smov 104   ;;  %s1784_s8 = smov 16  }
  0x97   : > { %vm1031_vm6 = vnez %v952_v30  ;;  %v839_v35 = vunpack.c.0.s8 %v838_v32  ;;  %s1404_s27 = sshll.u32 %s1764_s21, 9  ;;  %s1165_s12 = sshll.u32 %s2063_s23, 4  ;;  %s2137_s12 = int_to_ptr.vmem [resolvable:$true] %s1165_s12 }
  0x98   : > { %vm645_vm7 = vcmp.ne.s32.totalorder %v644_v31, 0  ;;  %v1032_v36 = vsel %vm1031_vm6, 16843009, %v1779_v5  ;;  %s2135_s26 = scalar_lea.hbm %s2226_s5, %s1404_s27  ;;  %s1137_s30 = scalar_lea.sflag [#allocation10], %s2011_s29 }
  0x99   : > { %vm840_vm8 = vcmp.ne.s32.totalorder %v839_v35, 0  ;;  %v1033_v41 = vunpack.c.0.s8 %v1032_v36  ;;  %s1654_s7 = scalar_lea.vmem %s2137_s12, 512  ;;  %p2260_p2 = scmp.ne.s32.totalorder %s2244_s6, 0 }
  0x9a   : > { %p1655_p11 = scmp.ne.s32.totalorder %s2137_s12, %s1654_s7  ;;  %s1785_s17 = smov [#allocation9]  }
  0x9b   : > { %vm1034_vm9 = vcmp.ne.s32.totalorder %v1033_v41, 0  ;;  %s1658_s14 = sshll.u32 %s1785_s17, 4  ;;  %s1659_s14 = int_to_ptr.vmem [resolvable:$false] %s1658_s14 }
  0x9c   : > { %p1656_p5 = pnand %p1655_p11, %p2260_p2  ;;  %p1661_p3 = scmp.lt.s32.totalorder %s2137_s12, %s1659_s14 }
  0x9e   : > { %p1657_p7 = pneg %p1656_p5 }
  0xee   : > { %v567_v18 = vpop.permute.xlu1 %566 }
  0xf2   : > { %v565_v20 = vpop.permute.xlu1 %564 }
  0xf6   : > { %v760_v22 = vpop.permute.xlu1 %759 }
  0xfa   : > { %v956_v25 = vpop.permute.xlu1 %955 }
  0xfe   : > { %v954_v26 = vpop.permute.xlu1 %953 }
 0x152   : > { %v453_v8 = vpop.f32.mrb[0].mxu0 }
 0x153   : > { %v461_v9 = vsel %vm460_vm3, -1e+09, %v453_v8  ;;  %v1425_v10 = vpop.f32.mrb[1].mxu0 }
 0x154   : > { %v462_v11 = vsel %vm380_vm1, %v461_v9, -inf }
 0x155   : > { %463 = vmax.xlane.f32.xlu0 %v462_v11 }
 0x1e2   : > { %v464_v12 = vpop.xlane.xlu0 %463 }
 0x1e3   : > { %v465_v13 = vsub.f32 %v461_v9, %v464_v12 }
 0x1e5   : > { %v466_v14 = vmul.f32 1.442695, %v465_v13 }
 0x1e7   : > { %1548 = vpow2.f32 %v466_v14 }
 0x1f1   : > { %v1549_v15 = vpop.eup %1548 }
 0x1f2   : > { %v468_v16 = vsel %vm380_vm1, %v1549_v15, 0.0 }
 0x1f3   : > { %469 = vadd.xlane.f32.xlu0 %v468_v16 }
 0x209   : > { %761 = vrot.lane.b32.xlu0 %v362_v1, %s1781_s10 }
 0x280   : > { %v470_v19 = vpop.xlane.xlu0 %469 }
 0x281   : > { %1550 = vrcp.f32 %v470_v19 }
 0x284   : > { %v762_v24 = vpop.permute.xlu0 %761 }
 0x28b   : > { %v1551_v21 = vpop.eup %1550 }
 0x28c   : > { %v472_v23 = vmul.f32 %v1551_v21, %v1549_v15 }
 0x28e   : > { %473 = vst.msk [vmem:[%s2063_s23] sm:$0xff] %vm380_vm1, %v472_v23  ;;  %1429 = vmatmul.mubr.msk.f32.vlgmr.msra.gmra.mrb[0].mxu1 %vm380_vm1, %v472_v23 }
 0x28f   : > { %1432 = vmatpush3.xpose.msk.msra.mxu1 %vm380_vm1, %v567_v18  ;;  %1433 = vmatprep.mubr.msk.f32.mxu1 %vm1778_vm0, %v1777_v0 }
 0x290   : > { %1441 = vmatprep.subr.mxu1 %v1777_v0 }
 0x292   : > { %1434 = vmatmul.mubr.msk.f32.vlgmr.msra.gmra.mrb[2].mxu1 %vm380_vm1, %v565_v20 }
 0x293   : > { %1442 = vmatpush3.xpose.msk.msra.mxu1 %vm380_vm1, %v762_v24  ;;  %1443 = vmatprep.mubr.msk.f32.mxu1 %vm1778_vm0, %v1777_v0 }
 0x294   : > { %1451 = vmatprep.subr.mxu1 %v1777_v0 }
 0x296   : > { %1444 = vmatmul.mubr.msk.f32.vlgmr.msra.gmra.mrb[4].mxu1 %vm380_vm1, %v760_v22 }
 0x297   : > { %1452 = vmatpush3.xpose.msk.msra.mxu1 %vm380_vm1, %v956_v25  ;;  %1453 = vmatprep.mubr.msk.f32.mxu1 %vm1778_vm0, %v1777_v0 }
 0x29a   : > { %1454 = vmatmul.mubr.msk.f32.vlgmr.msra.gmra.mrb[6].mxu1 %vm380_vm1, %v954_v26 }
 0x361   : > { %v543_v33 = vpop.f32.mrb[0].mxu1 }
 0x362   : > { %547 = vst.msk [vmem:[%s2097_s22] sm:$0xff] %vm380_vm1, %v543_v33  ;;  %v1430_v34 = vpop.f32.mrb[1].mxu1 }
 0x365   : > { %v638_v37 = vpop.f32.mrb[2].mxu1 }
 0x366   : > { %v646_v38 = vsel %vm645_vm7, -1e+09, %v638_v37  ;;  %v1435_v39 = vpop.f32.mrb[3].mxu1 }
 0x367   : > { %v647_v40 = vsel %vm380_vm1, %v646_v38, -inf }
 0x368   : > { %648 = vmax.xlane.f32.xlu1 %v647_v40 }
 0x369   : > { %v833_v42 = vpop.f32.mrb[4].mxu1 }
 0x36a   : > { %v841_v43 = vsel %vm840_vm8, -1e+09, %v833_v42  ;;  %v1445_v44 = vpop.f32.mrb[5].mxu1 }
 0x36b   : > { %v842_v45 = vsel %vm380_vm1, %v841_v43, -inf }
 0x36c   : > { %843 = vmax.xlane.f32.xlu0 %v842_v45 }
 0x36d   : > { %v1027_v46 = vpop.f32.mrb[6].mxu1 }
 0x36e   : > { %v1035_v47 = vsel %vm1034_vm9, -1e+09, %v1027_v46  ;;  %v1455_v48 = vpop.f32.mrb[7].mxu1 }
 0x36f   : > { %v1036_v49 = vsel %vm380_vm1, %v1035_v47, -inf }
 0x370   : > { %1037 = vmax.xlane.f32.xlu1 %v1036_v49 }
 0x3f5   : > { %v649_v50 = vpop.xlane.xlu1 %648 }
 0x3f6   : > { %v650_v51 = vsub.f32 %v646_v38, %v649_v50 }
 0x3f8   : > { %v651_v52 = vmul.f32 1.442695, %v650_v51 }
 0x3f9   : > { %v844_v53 = vpop.xlane.xlu0 %843 }
 0x3fa   : > { %1552 = vpow2.f32 %v651_v52  ;;  %v845_v54 = vsub.f32 %v841_v43, %v844_v53 }
 0x3fc   : > { %v846_v55 = vmul.f32 1.442695, %v845_v54 }
 0x3fd   : > { %v1038_v60 = vpop.xlane.xlu1 %1037 }
 0x3fe   : > { %1554 = vpow2.f32 %v846_v55  ;;  %v1039_v61 = vsub.f32 %v1035_v47, %v1038_v60 }
 0x400   : > { %v1040_v62 = vmul.f32 1.442695, %v1039_v61 }
 0x402   : > { %1556 = vpow2.f32 %v1040_v62 }
 0x404   : > { %v1553_v56 = vpop.eup %1552 }
 0x405   : > { %v653_v57 = vsel %vm380_vm1, %v1553_v56, 0.0 }
 0x406   : > { %654 = vadd.xlane.f32.xlu1 %v653_v57 }
 0x408   : > { %v1555_v58 = vpop.eup %1554 }
 0x409   : > { %v848_v59 = vsel %vm380_vm1, %v1555_v58, 0.0 }
 0x40a   : > { %849 = vadd.xlane.f32.xlu0 %v848_v59 }
 0x40c   : > { %v1557_v63 = vpop.eup %1556 }
 0x40d   : > { %v1042_v1 = vsel %vm380_vm1, %v1557_v63, 0.0 }
 0x417   : > { %855 = vrot.lane.b32.xlu1 %v2057_v17, %s1781_s10  ;;  %s1783_s10 = smov 8  }
 0x420   : > { %661 = vrot.lane.b32.xlu0 %v2057_v17, %s2258_s16 }
 0x43b   : > { %1043 = vadd.xlane.f32.xlu1 %v1042_v1 }
 0x44c   : > { %1049 = vrot.lane.b32.xlu1 %v2057_v17, %s2259_s15 }
 0x493   : > { %v655_v2 = vpop.xlane.xlu1 %654 }
 0x494   : > { %1558 = vrcp.f32 %v655_v2 }
 0x497   : > { %v850_v3 = vpop.xlane.xlu0 %849  ;;  %v856_v7 = vpop.permute.xlu1 %855 }
 0x498   : > { %1560 = vrcp.f32 %v850_v3 }
 0x49b   : > { %v662_v4 = vpop.permute.xlu0 %661 }
 0x49c   : > { %1437 = vmatpush3.msra.mxu0 %v662_v4 }
 0x49d   : > { %1446 = vmatprep.subr.mxu0 %v1777_v0 }
 0x49e   : > { %v1559_v5 = vpop.eup %1558 }
 0x49f   : > { %v657_v6 = vmul.f32 %v1559_v5, %v1553_v56 }
 0x4a1   : > { %1379 = vst.msk [vmem:[%s2063_s23 + $0x8] sm:$0xff] %vm380_vm1, %v657_v6  ;;  %1439 = vmatmul.mubr.msk.f32.vlgmr.msra.gmra.mrb[2].mxu0 %vm380_vm1, %v657_v6 }
 0x4a2   : > { %v1561_v8 = vpop.eup %1560  ;;  %1447 = vmatpush3.msra.mxu0 %v856_v7  ;;  %1448 = vmatprep.mubr.msk.f32.mxu0 %vm1778_vm0, %v1777_v0 }
 0x4a3   : > { %v852_v9 = vmul.f32 %v1561_v8, %v1555_v58  ;;  %1456 = vmatprep.subr.mxu0 %v1777_v0 }
 0x4a5   : > { %1387 = vst.msk [vmem:[%s2063_s23 + $0x10] sm:$0xff] %vm380_vm1, %v852_v9  ;;  %1449 = vmatmul.mubr.msk.f32.vlgmr.msra.gmra.mrb[4].mxu0 %vm380_vm1, %v852_v9 }
 0x4a6   : > { %1458 = vmatprep.mubr.msk.f32.mxu0 %vm1778_vm0, %v1777_v0 }
 0x4c8   : > { %v1044_v10 = vpop.xlane.xlu1 %1043 }
 0x4c9   : > { %1562 = vrcp.f32 %v1044_v10 }
 0x4cc   : > { %v1050_v11 = vpop.permute.xlu1 %1049 }
 0x4cd   : > { %1457 = vmatpush3.msra.mxu0 %v1050_v11 }
 0x4d3   : > { %v1563_v12 = vpop.eup %1562 }
 0x4d4   : > { %v1046_v13 = vmul.f32 %v1563_v12, %v1557_v63 }
 0x4d6   : > { %1395 = vst.msk [vmem:[%s2063_s23 + $0x18] sm:$0xff] %vm380_vm1, %v1046_v13  ;;  %1459 = vmatmul.mubr.msk.f32.vlgmr.msra.gmra.mrb[6].mxu0 %vm380_vm1, %v1046_v13  ;;  %s1660_s23 = scalar_lea.vmem %s1659_s14, 1024 }
 0x4d7   : > { %p1662_p0 = scmp.lt.s32.totalorder %s1660_s23, %s1654_s7 }
 0x4d9   : > { %p1663_p4 = por %p1662_p0, %p1661_p3 }
 0x4db   : > { %p1664_p10 = pnand %p1663_p4, %p1657_p7 }
 0x574   : > { %v733_v14 = vpop.f32.mrb[2].mxu0 }
 0x575   : > { %738 = vrot.lane.b32.xlu0 %v733_v14, %s1783_s10  ;;  %v1440_v15 = vpop.f32.mrb[3].mxu0 }
 0x578   : > { %v927_v0 = vpop.f32.mrb[4].mxu0 }
 0x579   : > { %932 = vrot.lane.b32.xlu1 %v927_v0, %s1784_s8  ;;  %v1450_v16 = vpop.f32.mrb[5].mxu0 }
 0x57a   : > { %1667 = shalt.err (!%p1664_p10)
}
 0x57b   : > { %s1668_s28 = scalar_lea.hbm %s2135_s26, 512  ;;  %s1672_s1 = scalar_lea.hbm %s2226_s5, 1024 }
 0x57c   : > { %p1669_p12 = scmp.ne.s32.totalorder %s2135_s26, %s1668_s28  ;;  %p1673_p9 = scmp.lt.u32.totalorder %s2135_s26, %s2226_s5 }
 0x57d   : > { %p1674_p6 = scmp.lt.u32.totalorder %s1672_s1, %s1668_s28  ;;  %p1676_p11 = scmp.lt.u32.totalorder %s1668_s28, %s2135_s26 }
 0x57e   : > { %p1670_p1 = pnand %p1669_p12, %p2260_p2 }
 0x57f   : > { %p1675_p13 = por %p1674_p6, %p1673_p9 }
 0x580   : > { %p1671_p8 = pneg %p1670_p1 }
 0x581   : > { %p1677_p5 = por %p1676_p11, %p1675_p13 }
 0x583   : > { %p1678_p7 = pnand %p1677_p5, %p1671_p8 }
 0x585   : > { %1681 = shalt.err (!%p1678_p7)
}
 0x586   : > { %s1786_s15 = smov 128   ;;  %s1787_s8 = smov 24   ;;  %vm741_vm10 = vcmask 130112   ;;  %vm935_vm11 = vcmask 195712   ;;  %vm1129_vm12 = vcmask 261312  }
 0x587   : > { %1468 = dma.vmem_to_hbm [thread:$0]  (%p2260_p2), %s2137_s12, 512, %s2135_s26, %s1137_s30, %s1786_s15, %s1786_s15, %s1783_s10  }
 0x588   : > { %s1399_s27 = sshll.u32 %s1764_s21, 7  ;;  %s1151_s24 = sshll.u32 %s2097_s22, 4  ;;  %s2173_s24 = int_to_ptr.vmem [resolvable:$true] %s1151_s24 }
 0x589   : > { %s2171_s10 = scalar_lea.hbm %s2225_s4, %s1399_s27  ;;  %s1132_s12 = scalar_lea.sflag [#allocation4], %s2011_s29 }
 0x58a   : > { %s1682_s26 = scalar_lea.vmem %s2173_s24, 128  ;;  %s1788_s21 = smov [#allocation8]  }
 0x58b   : > { %p1683_p3 = scmp.ne.s32.totalorder %s2173_s24, %s1682_s26  ;;  %s1686_s30 = sshll.u32 %s1788_s21, 4  ;;  %s1687_s30 = int_to_ptr.vmem [resolvable:$false] %s1686_s30 }
 0x58c   : > { %s1688_s17 = scalar_lea.vmem %s1687_s30, 256  ;;  %p1689_p10 = scmp.lt.s32.totalorder %s2173_s24, %s1687_s30 }
 0x58d   : > { %p1684_p0 = pnand %p1683_p3, %p2260_p2  ;;  %p1690_p12 = scmp.lt.s32.totalorder %s1688_s17, %s1682_s26 }
 0x58f   : > { %p1685_p4 = pneg %p1684_p0  ;;  %p1691_p1 = por %p1690_p12, %p1689_p10 }
 0x591   : > { %p1692_p8 = pnand %p1691_p1, %p1685_p4 }
 0x5a9   : > { %v1121_v17 = vpop.f32.mrb[6].mxu0 }
 0x5aa   : > { %1126 = vrot.lane.b32.xlu0 %v1121_v17, %s1787_s8  ;;  %v1460_v18 = vpop.f32.mrb[7].mxu0 }
 0x5e7   : > { %v739_v19 = vpop.permute.xlu0 %738 }
 0x5e8   : > { %742 = vst.msk [vmem:[%s2097_s22] sm:$0xff] %vm741_vm10, %v739_v19 }
 0x5eb   : > { %v933_v20 = vpop.permute.xlu1 %932 }
 0x5ec   : > { %936 = vst.msk [vmem:[%s2097_s22] sm:$0xff] %vm935_vm11, %v933_v20 }
 0x61c   : > { %v1127_v21 = vpop.permute.xlu0 %1126 }
 0x61d   : > { %1130 = vst.msk [vmem:[%s2097_s22] sm:$0xff] %vm1129_vm12, %v1127_v21 }
 0x61e   : > { %1695 = shalt.err (!%p1692_p8)
}
 0x61f   : > { %s1696_s29 = scalar_lea.hbm %s2171_s10, 128  ;;  %s1700_s23 = scalar_lea.hbm %s2225_s4, 256 }
 0x620   : > { %p1697_p9 = scmp.ne.s32.totalorder %s2171_s10, %s1696_s29  ;;  %p1701_p11 = scmp.lt.u32.totalorder %s2171_s10, %s2225_s4 }
 0x621   : > { %p1702_p5 = scmp.lt.u32.totalorder %s1700_s23, %s1696_s29  ;;  %p1704_p3 = scmp.lt.u32.totalorder %s1696_s29, %s2171_s10 }
 0x622   : > { %p1698_p6 = pnand %p1697_p9, %p2260_p2 }
 0x623   : > { %p1703_p7 = por %p1702_p5, %p1701_p11 }
 0x624   : > { %p1699_p13 = pneg %p1698_p6 }
 0x625   : > { %p1705_p0 = por %p1704_p3, %p1703_p7 }
 0x627   : > { %p1706_p4 = pnand %p1705_p0, %p1699_p13 }
 0x629   : > { %1709 = shalt.err (!%p1706_p4)
}
 0x62a   : > { %1467 = dma.vmem_to_hbm [thread:$0]  (%p2260_p2), %s2173_s24, 128, %s2171_s10, %s1132_s12  }
 0x62b PF: > { %s2261_s13 = sld [smem:[#allocation19_spill]]  ;;  %s2262_s1 = sld [smem:[#allocation16_spill]] }
 0x62c   : > { %s1180_s11 = sand.u32 1, %s1752_s18  }
 0x62d   : > { %s1181_s16 = scalar_lea.sflag [#allocation4], %s1180_s11 }
 0x631   : > { %p2263_p10 = scmp.ne.s32.totalorder %s2261_s13, 0  ;;  %p2264_p12 = scmp.ge.s32.totalorder %s2262_s1, 2 }
 0x633   : > { %p1482_p1 = pnand %p2264_p12, %p2263_p10 }
 0x635   : > { %1743 = dma.done.wait (!%p1482_p1), %s1181_s16, 128  }
 0x636   : > { %1745 = vsyncadd (!%p1482_p1), %s1181_s16, 4294967168  ;;  %s1190_s15 = scalar_lea.sflag [#allocation10], %s1180_s11 }
 0x637   : > { %1747 = dma.done.wait (!%p1482_p1), %s1190_s15, 512  }
 0x638   : > { %1749 = vsyncadd (!%p1482_p1), %s1190_s15, 4294966784  ;;  %s28_s23 = sadd.s32 1, %s2262_s1   ;;  %s2265_s6 = sld [smem:[#allocation18_spill]] }
 0x639   : > { %p25_p8 = scmp.ge.s32.totalorder %s28_s23, 4   ;;  %s2266_s21 = sld [smem:[#allocation15_spill]] }
 0x63a   : > { %s2267_s22 = sld [smem:[#allocation17_spill]]  ;;  %s2268_s18 = smov %s1756_s19 }
 0x63b   : > { %s2269_s19 = smov %s1760_s20  ;;  %27 = sbr.rel (!%p25_p8) target bundleno = 12 (0xc), region = 132 }
 0x63e   : > { %s2270_s20 = smov %s2265_s6 }
 0x642   :  { %1195 = vsyncpa [#allocation3], 1 }
 0x643   :  { %1197 = vsyncpa [#allocation3 + $0x1], 1 }
 0x644   :  { %1198 = vsyncpa [#allocation6], 1 }
 0x645   :  { %1200 = vsyncpa [#allocation6 + $0x1], 1 }
 0x646   :  { %1201 = vsyncpa [#allocation4], 1 }
 0x647   :  { %1203 = vsyncpa [#allocation4 + $0x1], 1 }
 0x648   :  { %1204 = vsyncpa [#allocation10], 1 }
 0x649   :  { %1206 = vsyncpa [#allocation10 + $0x1], 1 }

</bundles_post_ra>
